<compile_context>
chip_gen: v7x
topology: tpu7x:2x2x1
jax: 0.10.0
libtpu: 0.0.40
codegen_flags: <defaults>
</compile_context>

<pallas_src>
import functools

import jax
import jax.numpy as jnp
from jax import lax
from jax.experimental import pallas as pl
from jax.experimental.pallas import tpu as pltpu


def _bprmax_kernel(x_ref, d_ref, out_ref, *, n_rows):
    i = pl.program_id(0)
    x = x_ref[...].astype(jnp.float32)          # (TM, N) row tile
    d = d_ref[...].astype(jnp.float32)          # (1, N)  diagonal (resident)
    tm, n = x.shape

    ragged = (n_rows % tm) != 0                 # static at trace time
    if ragged:
        row_ids = i * tm + lax.broadcasted_iota(jnp.int32, (tm, 1), 0)
        row_valid = row_ids < n_rows            # (TM, 1)
        # Sanitize out-of-range (padded) rows so no NaN/Inf garbage propagates.
        x = jnp.where(row_valid, x, 0.0)

    # Row-wise numerically-stable softmax numerator.
    m = jnp.max(x, axis=1, keepdims=True)       # (TM, 1)
    e = jnp.exp(x - m)                          # (TM, N)   EUP

    # sigmoid(d_j - x_ij) = 1 / (1 + exp(x_ij - d_j)); reciprocal on the EUP.
    sig = pl.reciprocal(1.0 + jnp.exp(x - d), approx=True)   # (TM, N)

    # Lane-axis reductions on the (otherwise idle) MXU instead of the XLU.
    ones = jnp.ones((n, 1), jnp.float32)
    row_sum = jnp.dot(e, ones, preferred_element_type=jnp.float32)        # (TM, 1)
    row_num = jnp.dot(e * sig, ones, preferred_element_type=jnp.float32)  # (TM, 1)

    # sum_j sm[i,j] * sig[i,j]  ==  (sum_j e[i,j] * sig[i,j]) / row_sum[i]
    per_row = row_num * pl.reciprocal(row_sum, approx=True)               # (TM, 1)
    if ragged:
        per_row = jnp.where(row_valid, per_row, 0.0)
    partial = jnp.sum(per_row, axis=0, keepdims=True)                     # (1, 1)

    # Accumulate into the resident output block (reduction axis == grid axis).
    @pl.when(i == 0)
    def _():
        out_ref[...] = jnp.zeros_like(out_ref)

    out_ref[...] += partial

    @pl.when(i == pl.num_programs(0) - 1)
    def _():
        inv_count = jnp.float32(1.0 / (n_rows * n_rows))
        out_ref[...] = -jnp.log(out_ref[...] * inv_count)


def _round_up(x: int, m: int) -> int:
    return ((x + m - 1) // m) * m


def bpr_max_loss(logit: jax.Array, *, tm_max: int = 256) -> jax.Array:
    """BPR-max loss for a square [N, N] score matrix. Returns a scalar (f32)."""
    assert logit.ndim == 2 and logit.shape[0] == logit.shape[1], "logit must be square"
    n = logit.shape[0]

    # Pick the largest row tile (multiple of 8) whose double-buffered input stays
    # within a conservative VMEM budget, so it also fits v7x / default scoped limits.
    bytes_per = jnp.dtype(logit.dtype).itemsize
    budget = 12 * 1024 * 1024
    tm = budget // max(1, 2 * n * bytes_per)
    tm = max(8, min(tm_max, (tm // 8) * 8))
    tm = min(tm, _round_up(n, 8))

    grid = (pl.cdiv(n, tm),)
    diag = jnp.diagonal(logit).reshape(1, n)   # tiny (1, N) side input

    kernel = functools.partial(_bprmax_kernel, n_rows=n)
    out = pl.pallas_call(
        kernel,
        out_shape=jax.ShapeDtypeStruct((1, 1), jnp.float32),
        grid_spec=pltpu.PrefetchScalarGridSpec(
            num_scalar_prefetch=0,
            grid=grid,
            in_specs=[
                pl.BlockSpec((tm, n), lambda i: (i, 0)),   # row tile of logits
                pl.BlockSpec((1, n), lambda i: (0, 0)),    # diagonal, resident
            ],
            out_specs=pl.BlockSpec((1, 1), lambda i: (0, 0)),  # scalar accumulator
        ),
        compiler_params=pltpu.CompilerParams(
            dimension_semantics=("arbitrary",),  # reduction axis -> serial accumulate
        ),
    )(logit, diag)
    return out[0, 0]


def _reference(logit: jax.Array) -> jax.Array:
    # Pure-JAX reference mirroring the PyTorch forward.
    x = logit.astype(jnp.float32)
    sm = jax.nn.softmax(x, axis=1)
    d = jnp.diag(x)
    diff = d[None, :] - x  # (diag.view(-1,1).expand_as(logit)).T - logit
    return -jnp.log(jnp.mean(sm * jax.nn.sigmoid(diff)))


if __name__ == "__main__":
    key = jax.random.PRNGKey(0)
    # Small square score matrices: single tile, single ragged-free tile, multi-tile ragged.
    for n in (8, 200, 384):
        key, sub = jax.random.split(key)
        logit = jax.random.normal(sub, (n, n), dtype=jnp.float32)

        loss = jax.block_until_ready(bpr_max_loss(logit))
        ref = jax.block_until_ready(_reference(logit))

        # Tolerance accounts for the EUP approximate reciprocals (loss scalar).
        assert jnp.allclose(loss, ref, rtol=2e-3, atol=2e-3), (n, loss, ref)
    print("KERNEL_OK")
</pallas_src>

<mosaic_0001>
module attributes {stable_mosaic.version = 11 : i64} {
  func.func @_bprmax_kernel(%arg0: i32, %arg1: memref<8x8xf32, #tpu.memory_space<vmem>>, %arg2: memref<1x8xf32, #tpu.memory_space<vmem>>, %arg3: memref<1x1xf32, #tpu.memory_space<vmem>>) attributes {dimension_semantics = [#tpu.dimension_semantics<arbitrary>], iteration_bounds = array<i64: 1>, scalar_prefetch = 0 : i64, scratch_operands = 0 : i64, tpu.core_type = #tpu.core_type<tc>, window_params = [{transform_indices = @transform_0, window_bounds = array<i64: 8, 8>}, {pipeline_mode = #tpu.pipeline_mode<synchronous>, transform_indices = @transform_1, window_bounds = array<i64: 1, 8>}, {pipeline_mode = #tpu.pipeline_mode<synchronous>, transform_indices = @transform_2, window_bounds = array<i64: 1, 1>}]} {
    %c0 = arith.constant 0 : index
    %c0_0 = arith.constant 0 : index
    %0 = vector.load %arg1[%c0, %c0_0] : memref<8x8xf32, #tpu.memory_space<vmem>>, vector<8x8xf32>
    %c0_1 = arith.constant 0 : index
    %c0_2 = arith.constant 0 : index
    %1 = vector.load %arg2[%c0_1, %c0_2] : memref<1x8xf32, #tpu.memory_space<vmem>>, vector<1x8xf32>
    %cst = arith.constant dense<0xFF800000> : vector<8xf32>
    %2 = vector.multi_reduction <maximumf>, %0, %cst [1] : vector<8x8xf32> to vector<8xf32>
    %3 = vector.shape_cast %2 : vector<8xf32> to vector<8x1xf32>
    %4 = vector.broadcast %3 : vector<8x1xf32> to vector<8x8xf32>
    %5 = arith.subf %0, %4 : vector<8x8xf32>
    %6 = math.exp %5 : vector<8x8xf32>
    %7 = vector.broadcast %1 : vector<1x8xf32> to vector<8x8xf32>
    %8 = arith.subf %0, %7 : vector<8x8xf32>
    %9 = math.exp %8 : vector<8x8xf32>
    %cst_3 = arith.constant 1.000000e+00 : f32
    %10 = vector.broadcast %cst_3 : f32 to vector<8x8xf32>
    %11 = arith.addf %10, %9 : vector<8x8xf32>
    %12 = tpu.reciprocal %11 {approx = true} : vector<8x8xf32> -> vector<8x8xf32>
    %cst_4 = arith.constant 1.000000e+00 : f32
    %13 = vector.broadcast %cst_4 : f32 to vector<8x1xf32>
    %cst_5 = arith.constant dense<0.000000e+00> : vector<8x1xf32>
    %14 = tpu.matmul %6, %13, %cst_5 {dimension_numbers = #tpu.dot_dimension_numbers<[1], [0], [0], [1], [0, 0, 1, 1], [], []>} : vector<8x8xf32>, vector<8x1xf32>, vector<8x1xf32> -> vector<8x1xf32>
    %15 = arith.mulf %6, %12 : vector<8x8xf32>
    %cst_6 = arith.constant dense<0.000000e+00> : vector<8x1xf32>
    %16 = tpu.matmul %15, %13, %cst_6 {dimension_numbers = #tpu.dot_dimension_numbers<[1], [0], [0], [1], [0, 0, 1, 1], [], []>} : vector<8x8xf32>, vector<8x1xf32>, vector<8x1xf32> -> vector<8x1xf32>
    %17 = tpu.reciprocal %14 {approx = true} : vector<8x1xf32> -> vector<8x1xf32>
    %18 = arith.mulf %16, %17 : vector<8x1xf32>
    %cst_7 = arith.constant dense<0.000000e+00> : vector<1xf32>
    %19 = vector.multi_reduction <add>, %18, %cst_7 [0] : vector<8x1xf32> to vector<1xf32>
    %20 = vector.shape_cast %19 : vector<1xf32> to vector<1x1xf32>
    %c0_i32 = arith.constant 0 : i32
    %21 = arith.cmpi eq, %arg0, %c0_i32 : i32
    %22 = arith.extui %21 : i1 to i32
    %c0_i32_8 = arith.constant 0 : i32
    %23 = arith.cmpi ne, %22, %c0_i32_8 : i32
    scf.if %23 {
      %cst_15 = arith.constant 0.000000e+00 : f32
      %30 = vector.broadcast %cst_15 : f32 to vector<1x1xf32>
      %c0_16 = arith.constant 0 : index
      %c0_17 = arith.constant 0 : index
      %31 = vector.load %arg3[%c0_16, %c0_17] : memref<1x1xf32, #tpu.memory_space<vmem>>, vector<1x1xf32>
      tpu.vector_store %arg3[%c0_16, %c0_17], %30 {strides = array<i32>} : memref<1x1xf32, #tpu.memory_space<vmem>>, vector<1x1xf32>,
    } else {
    }
    %c0_9 = arith.constant 0 : index
    %c0_10 = arith.constant 0 : index
    %24 = vector.load %arg3[%c0_9, %c0_10] : memref<1x1xf32, #tpu.memory_space<vmem>>, vector<1x1xf32>
    %25 = arith.addf %24, %20 : vector<1x1xf32>
    %c0_11 = arith.constant 0 : index
    %c0_12 = arith.constant 0 : index
    %26 = vector.load %arg3[%c0_11, %c0_12] : memref<1x1xf32, #tpu.memory_space<vmem>>, vector<1x1xf32>
    tpu.vector_store %arg3[%c0_11, %c0_12], %25 {strides = array<i32>} : memref<1x1xf32, #tpu.memory_space<vmem>>, vector<1x1xf32>,
    %c0_i32_13 = arith.constant 0 : i32
    %27 = arith.cmpi eq, %arg0, %c0_i32_13 : i32
    %28 = arith.extui %27 : i1 to i32
    %c0_i32_14 = arith.constant 0 : i32
    %29 = arith.cmpi ne, %28, %c0_i32_14 : i32
    scf.if %29 {
      %c0_15 = arith.constant 0 : index
      %c0_16 = arith.constant 0 : index
      %30 = vector.load %arg3[%c0_15, %c0_16] : memref<1x1xf32, #tpu.memory_space<vmem>>, vector<1x1xf32>
      %cst_17 = arith.constant 1.562500e-02 : f32
      %31 = vector.broadcast %cst_17 : f32 to vector<1x1xf32>
      %32 = arith.mulf %30, %31 : vector<1x1xf32>
      %33 = math.log %32 : vector<1x1xf32>
      %cst_18 = arith.constant 0.000000e+00 : f32
      %34 = vector.broadcast %cst_18 : f32 to vector<1x1xf32>
      %35 = arith.subf %34, %33 : vector<1x1xf32>
      %c0_19 = arith.constant 0 : index
      %c0_20 = arith.constant 0 : index
      %36 = vector.load %arg3[%c0_19, %c0_20] : memref<1x1xf32, #tpu.memory_space<vmem>>, vector<1x1xf32>
      tpu.vector_store %arg3[%c0_19, %c0_20], %35 {strides = array<i32>} : memref<1x1xf32, #tpu.memory_space<vmem>>, vector<1x1xf32>,
    } else {
    }
    return
  }
  func.func @transform_0(%arg0: i32) -> (i32, i32) {
    %c0_i32 = arith.constant 0 : i32
    %c0_i32_0 = arith.constant 0 : i32
    return %arg0, %c0_i32 : i32, i32
  }
  func.func @transform_1(%arg0: i32) -> (i32, i32) {
    %c0_i32 = arith.constant 0 : i32
    %c0_i32_0 = arith.constant 0 : i32
    %c0_i32_1 = arith.constant 0 : i32
    return %c0_i32, %c0_i32_0 : i32, i32
  }
  func.func @transform_2(%arg0: i32) -> (i32, i32) {
    %c0_i32 = arith.constant 0 : i32
    %c0_i32_0 = arith.constant 0 : i32
    %c0_i32_1 = arith.constant 0 : i32
    return %c0_i32, %c0_i32_0 : i32, i32
  }
}

</mosaic_0001>

<bundles_post_ra>
// kernel: tpu_custom_call.1
= control target key start
LH: loop header
LB: loop body
LE: loop exit
PB: predicated region body
PF: predicated region fallthrough
CT: control target
= control target key end

     0   :  { %7 = vsyncpa [#allocation3], 0  ;;  %s368_s0 = inlined_call_operand.hbm [shape: f32[8,8], index: 0, kind: input, shape index: {}]   ;;  %s369_s1 = inlined_call_operand.vmem [shape: f32[1,8], index: 1, kind: input, shape index: {}]   ;;  %s370_s2 = inlined_call_operand.hbm [shape: f32[1,1], index: 2, kind: output, shape index: {}]  }
   0x1   :  { %8 = vsyncpa [#allocation4], 0  ;;  %s315_s9 = smov [#allocation2]   ;;  %s267_s13 = scalar_lea.hbm %s368_s0, 128 }
   0x2   :  { %s15_s10 = sshll.u32 %s315_s9, 4  ;;  %p268_p0 = scmp.ne.s32.totalorder %s368_s0, %s267_s13  ;;  %s16_s10 = int_to_ptr.vmem [resolvable:$true] %s15_s10 }
   0x3   :  { %p271_p1 = scmp.lt.u32.totalorder %s267_s13, %s368_s0 }
   0x5   :  { %p273_p2 = pnand %p271_p1, %p268_p0 }
   0x7   :  { %276 = shalt.err (!%p273_p2)
}
   0x8   :  { %s277_s18 = scalar_lea.vmem %s16_s10, 128  ;;  %p282_p4 = scmp.lt.s32.totalorder %s16_s10, %s16_s10 }
   0x9   :  { %p278_p3 = scmp.ne.s32.totalorder %s16_s10, %s277_s18  ;;  %p283_p5 = scmp.lt.s32.totalorder %s277_s18, %s277_s18 }
   0xb   :  { %p284_p6 = por %p283_p5, %p282_p4 }
   0xd   :  { %p285_p7 = pnand %p284_p6, %p278_p3 }
   0xf   :  { %288 = shalt.err (!%p285_p7)
}
  0x10   :  { %18 = dma.hbm_to_vmem [thread:$0]  %s368_s0, 128, %s16_s10, [#allocation3]  }
  0x11   :  { %311 = dma.done.wait [#allocation3], 128  }
  0x12   :  { %312 = vsyncadd [#allocation3], 4294967168  ;;  %vm26_vm0 = vcmask 64512   ;;  %v24_v0 = vld [vmem:[#allocation2] sm:$0xff]  ;;  %v316_v2 = vmov 0.0   ;;  %vm317_vm1 = vmmov 0  }
  0x13   :  { %v27_v1 = vsel %vm26_vm0, %v24_v0, -inf  ;;  %242 = vmatprep.subr.mxu0 %v316_v2  ;;  %244 = vmatprep.mubr.msk.f32.mxu0 %vm317_vm1, %v316_v2  ;;  %v318_v3 = vmov 1.0   ;;  %v235_v4 = vld [vmem:[%s369_s1] ss:$0 sm:$0xff]  ;;  %vm205_vm2 = vcmask 0   ;;  %vm193_vm3 = vcmask 7168  }
  0x14   :  { %28 = vmax.xlane.f32.xlu0 %v27_v1  ;;  %243 = vmatpush3.msra.mxu0 %v318_v3  ;;  %v39_v5 = vsub.f32 %v24_v0, %v235_v4  ;;  %206 = vst.msk [vmem:[#allocation5] sm:$0x1] %vm205_vm2, %v316_v2  ;;  %s319_s0 = smov [#allocation5]  }
  0x15   :  { %247 = vmatprep.subr.mxu1 %v316_v2  ;;  %249 = vmatprep.mubr.msk.f32.mxu1 %vm317_vm1, %v316_v2  ;;  %s226_s1 = sshll.u32 %s319_s0, 4  ;;  %s227_s1 = int_to_ptr.vmem [resolvable:$true] %s226_s1 }
  0x16   :  { %248 = vmatpush3.msra.mxu1 %v318_v3  ;;  %v40_v6 = vmul.f32 1.442695, %v39_v5  ;;  %s289_s23 = scalar_lea.vmem %s227_s1, 16  ;;  %s293_s24 = scalar_lea.vmem %s227_s1, 32 }
  0x17   :  { %p290_p8 = scmp.ne.s32.totalorder %s227_s1, %s289_s23  ;;  %p294_p9 = scmp.lt.s32.totalorder %s227_s1, %s227_s1 }
  0x18   :  { %257 = vpow2.f32 %v40_v6  ;;  %p295_p10 = scmp.lt.s32.totalorder %s293_s24, %s289_s23 }
  0x1a   :  { %p296_p11 = por %p295_p10, %p294_p9 }
  0x1b   :  { %v207_v27 = vld [vmem:[#allocation5] sm:$0x1] }
  0x1c   :  { %p297_p12 = pnand %p296_p11, %p290_p8 }
  0x22   :  { %v258_v7 = vpop.eup %257 }
  0x23   :  { %v42_v8 = vadd.f32 1.0, %v258_v7 }
  0x25   :  { %259 = vrcp.f32 %v42_v8 }
  0x2f   :  { %v260_v12 = vpop.eup %259 }
  0xa1   :  { %v29_v9 = vpop.xlane.xlu0 %28 }
  0xa2   :  { %v30_v10 = vsub.f32 %v24_v0, %v29_v9 }
  0xa4   :  { %v31_v11 = vmul.f32 1.442695, %v30_v10 }
  0xa6   :  { %261 = vpow2.f32 %v31_v11 }
  0xb0   :  { %v262_v13 = vpop.eup %261 }
  0xb1   :  { %245 = vmatmul.mubr.msk.f32.vlgmr.msra.gmra.mrb[0].mxu0 %vm26_vm0, %v262_v13  ;;  %v117_v14 = vmul.f32 %v262_v13, %v260_v12 }
  0xb3   :  { %250 = vmatmul.mubr.msk.f32.vlgmr.msra.gmra.mrb[0].mxu1 %vm26_vm0, %v117_v14 }
 0x184   :  { %v113_v15 = vpop.f32.mrb[0].mxu0 }
 0x185   :  { %263 = vrcp.f32 %v113_v15  ;;  %v246_v16 = vpop.f32.mrb[1].mxu0 }
 0x186   :  { %v187_v17 = vpop.f32.mrb[0].mxu1 }
 0x187   :  { %v251_v18 = vpop.f32.mrb[1].mxu1 }
 0x18f   :  { %v264_v19 = vpop.eup %263 }
 0x190   :  { %v192_v20 = vmul.f32 %v264_v19, %v187_v17 }
 0x192   :  { %v194_v21 = vsel %vm193_vm3, %v192_v20, 0.0 }
 0x193   :  { %v195_v22 = vrot.slane %v194_v21, 4 }
 0x195   :  { %v196_v23 = vadd.f32 %v195_v22, %v194_v21 }
 0x197   :  { %v197_v24 = vrot.slane %v196_v23, 2 }
 0x199   :  { %v198_v25 = vadd.f32 %v197_v24, %v196_v23 }
 0x19b   :  { %v199_v26 = vrot.slane %v198_v25, 1 }
 0x19d   :  { %v200_v28 = vadd.f32 %v199_v26, %v198_v25 }
 0x19f   :  { %v208_v29 = vadd.f32 %v207_v27, %v200_v28 }
 0x1a1   :  { %210 = vst.msk [vmem:[#allocation5] sm:$0x1] %vm205_vm2, %v208_v29 }
 0x1a8   :  { %v214_v30 = vld [vmem:[#allocation5] sm:$0x1] }
 0x1a9   :  { %v215_v31 = vmul.f32 0.015625, %v214_v30 }
 0x1ab   :  { %265 = vlog2.f32 %v215_v31 }
 0x1b5   :  { %v266_v32 = vpop.eup %265 }
 0x1b6   :  { %v217_v33 = vmul.f32 0.6931472, %v266_v32 }
 0x1b8   :  { %v218_v34 = vsub.f32 0.0, %v217_v33 }
 0x1ba   :  { %219 = vst.msk [vmem:[#allocation5] sm:$0x1] %vm205_vm2, %v218_v34 }
 0x1bb   :  { %300 = shalt.err (!%p297_p12)
}
 0x1bc   :  { %s301_s27 = scalar_lea.hbm %s370_s2, 16 }
 0x1bd   :  { %p302_p13 = scmp.ne.s32.totalorder %s370_s2, %s301_s27  ;;  %p305_p0 = scmp.lt.u32.totalorder %s301_s27, %s370_s2 }
 0x1bf   :  { %p307_p1 = pnand %p305_p0, %p302_p13 }
 0x1c1   :  { %310 = shalt.err (!%p307_p1)
}
 0x1c2   :  { %229 = dma.vmem_to_hbm [thread:$0]  %s227_s1, 16, %s370_s2, [#allocation4]  }
 0x1c3   :  { %313 = dma.done.wait [#allocation4], 16  }
 0x1c4   :  { %314 = vsyncadd [#allocation4], 4294967280 }
 0x1c5   :  { %233 = vsyncpa [#allocation3], 1 }
 0x1c6   :  { %234 = vsyncpa [#allocation4], 1 }

</bundles_post_ra>
